<compile_context>
chip_gen: v7x
topology: tpu7x:2x2x1
jax: 0.10.0
libtpu: 0.0.40
codegen_flags: <defaults>
</compile_context>

<pallas_src>
import jax
import jax.numpy as jnp
from jax import lax
from jax.experimental import pallas as pl
from jax.experimental.pallas import tpu as pltpu


def _round_up(a, m):
    return (a + m - 1) // m * m


def _elu(v):
    # PyTorch nn.ELU default alpha = 1.0.  min() keeps exp() finite on the
    # (discarded) positive branch.
    # TODO(synk): jnp.expm1 is marginally more accurate for tiny negative
    # inputs; plain exp keeps the guaranteed-supported Mosaic lowering.
    return jnp.where(v > 0, v, jnp.exp(jnp.minimum(v, 0.0)) - 1.0)


def _make_kernel(TB, P1, P2, P3, C_in, C, offs):
    (o_w1, o_b1, o_w2, o_b2, o_w3, o_b3, o_w4, o_b4) = offs
    n1 = TB * P1 - 8   # conv1 rows computed (keeps k=1,2 tap reads in-bounds)
    n2 = TB * P2       # conv2 rows (per-batch padded length P2 = P1 // 2)
    n3 = TB * P3       # conv3 / conv4 rows (per-batch padded length P3)

    def kernel(x_ref, w_ref, fc_ref, out_ref, h1_ref, h2_ref, h3_ref):
        # ---- Conv1d(C_in->C, k=3, s=1) + ELU : ONE matmul for the block ---
        cols1 = jnp.concatenate(
            [x_ref[pl.ds(k, n1), :] for k in range(3)], axis=1)
        h1 = _elu(jnp.dot(cols1, w_ref[pl.ds(o_w1, 3 * C_in), :],
                          preferred_element_type=jnp.float32)
                  + w_ref[pl.ds(o_b1, 1), :])
        h1_ref[pl.ds(0, n1), :] = h1
        # Tail rows are never valid outputs, but must stay finite: garbage
        # rows eventually multiply ZERO columns of the fc weight, and
        # NaN * 0 would contaminate valid results.
        h1_ref[pl.ds(n1, 8), :] = jnp.zeros((8, C), jnp.float32)

        # ---- Conv1d(C->C, k=2, s=2) + ELU ---------------------------------
        # Strided taps must come from a ref (SSA values have no strided
        # slice); P1 even keeps stride-2 taps aligned at batch boundaries.
        cols2 = jnp.concatenate(
            [h1_ref[pl.ds(k, n2, stride=2), :] for k in range(2)], axis=1)
        h2 = _elu(jnp.dot(cols2, w_ref[pl.ds(o_w2, 2 * C), :],
                          preferred_element_type=jnp.float32)
                  + w_ref[pl.ds(o_b2, 1), :])
        h2_ref[pl.ds(0, n2), :] = h2
        h2_ref[pl.ds(n2, 8), :] = jnp.zeros((8, C), jnp.float32)

        # ---- Conv1d(C->C, k=3, s=2) + ELU ---------------------------------
        cols3 = jnp.concatenate(
            [h2_ref[pl.ds(k, n3, stride=2), :] for k in range(3)], axis=1)
        h3 = _elu(jnp.dot(cols3, w_ref[pl.ds(o_w3, 3 * C), :],
                          preferred_element_type=jnp.float32)
                  + w_ref[pl.ds(o_b3, 1), :])
        h3_ref[pl.ds(0, n3), :] = h3
        h3_ref[pl.ds(n3, 8), :] = jnp.zeros((8, C), jnp.float32)

        # ---- Conv1d(C->C, k=3, s=1) + ELU ---------------------------------
        cols4 = jnp.concatenate(
            [h3_ref[pl.ds(k, n3), :] for k in range(3)], axis=1)
        h4 = _elu(jnp.dot(cols4, w_ref[pl.ds(o_w4, 3 * C), :],
                          preferred_element_type=jnp.float32)
                  + w_ref[pl.ds(o_b4, 1), :])            # (TB*P3, C)

        # ---- nn.Linear(num_channels, num_classes) along the conv length
        #      axis (PyTorch module semantics; L4 == num_channels).  One
        #      block-diagonal matmul contracts the sublane axis of the whole
        #      batched h4 slab; padded / garbage rows hit zero columns.  The
        #      (C, TB*N) result is the lane-dense per-step output block.
        pred = lax.dot_general(
            h4, fc_ref[pl.ds(0, n3), :],
            dimension_numbers=(((0,), (0,)), ((), ())),
            preferred_element_type=jnp.float32)          # (C, TB*N)
        out_ref[0] = pred + fc_ref[pl.ds(n3, 1), :]

    return kernel


def article_classifier_forward(x_ncl, params, apply_softmax=False):
    (w1, b1), (w2, b2), (w3, b3), (w4, b4), (fcw, fcb) = params
    B, C_in, L = x_ncl.shape
    C = w1.shape[0]
    N = fcw.shape[0]
    f32 = jnp.float32

    # VALID conv output lengths, matching the PyTorch Sequential.
    L1 = L - 2
    L2 = (L1 - 2) // 2 + 1
    L3 = (L2 - 3) // 2 + 1
    L4 = L3 - 2
    assert L4 == fcw.shape[1], (
        "nn.Linear(num_channels, ...) is applied to the conv length axis; "
        "the conv output length must equal num_channels")

    # Per-batch padded segment lengths.  P1 is a multiple of 16 so that the
    # stride-2 taps of conv2/conv3 stay aligned at every batch boundary, and
    # P1 >= L1 + 8 so the last batch's valid rows survive the 8-row tail we
    # drop to keep conv1's k=1,2 tap reads inside the input block.
    P1 = _round_up(max(L, L1 + 8), 16)
    P2 = P1 // 2
    P3 = P2 // 2
    assert P1 >= L and L2 <= P2 and L3 <= P3

    # Batch block size: aim for ~8 grid steps (pipelining, both TCs on v7x),
    # cap at 64 so the VMEM working set (16x lane padding with small C) and
    # the TB^2-sized block-diagonal fc weight stay well under v7x's 64 MiB.
    if B <= 8:
        TB = B
    else:
        TB = min(64, max(8, pl.cdiv(B, 8)))
        TB = (TB // 8) * 8
    B_pad = pl.cdiv(B, TB) * TB
    steps = B_pad // TB

    # ---- input: NCL -> zero-padded NLC 2-D slab (B_pad*P1, C_in) ----------
    x_nlc = jnp.transpose(x_ncl, (0, 2, 1)).astype(f32)        # (B, L, C_in)
    x_nlc = jnp.pad(x_nlc, ((0, B_pad - B), (0, P1 - L), (0, 0)))
    x2d = x_nlc.reshape(B_pad * P1, C_in)

    # ---- conv weights: tap-major (K*C_in, C_out) + biases, packed into ONE
    #      slab with 8-row-aligned sections (single operand / DMA) -----------
    def pack(w):  # (C_out, C_in, K) -> (K*C_in, C_out), tap-major rows
        k = w.shape[2]
        return jnp.transpose(w, (2, 1, 0)).reshape(k * w.shape[1], w.shape[0])

    pieces = [pack(w1), b1.reshape(1, -1), pack(w2), b2.reshape(1, -1),
              pack(w3), b3.reshape(1, -1), pack(w4), b4.reshape(1, -1)]
    offs, padded, acc = [], [], 0
    for p in pieces:
        offs.append(acc)
        r8 = _round_up(p.shape[0], 8)
        padded.append(jnp.pad(p.astype(f32), ((0, r8 - p.shape[0]), (0, 0))))
        acc += r8
    wslab = jnp.concatenate(padded, axis=0)                    # (acc, C)

    # ---- fc: block-diagonal kron(I_TB, fcw^T) + tiled bias row -------------
    fcw_pad = jnp.zeros((P3, N), f32).at[:L4, :].set(fcw.astype(f32).T)
    blockdiag = jnp.kron(jnp.eye(TB, dtype=f32), fcw_pad)      # (TB*P3, TB*N)
    fcslab = jnp.concatenate(
        [blockdiag, jnp.tile(fcb.astype(f32), TB)[None, :]], axis=0)

    kernel = _make_kernel(TB, P1, P2, P3, C_in, C, tuple(offs))

    flops = 2 * B_pad * (L1 * 3 * C_in * C
                         + (L2 * 2 + L3 * 3 + L4 * 3) * C * C
                         + C * L4 * N)
    cost = pl.CostEstimate(
        flops=int(flops),
        transcendentals=int(B_pad * (L1 + L2 + L3 + L4) * C),
        bytes_accessed=int(4 * (x2d.size + wslab.size + fcslab.size
                                + steps * C * TB * N)))

    out = pl.pallas_call(
        kernel,
        out_shape=jax.ShapeDtypeStruct((steps, C, TB * N), f32),
        grid=(steps,),
        in_specs=[
            pl.BlockSpec((TB * P1, C_in), lambda i: (i, 0)),
            pl.BlockSpec(wslab.shape, lambda i: (0, 0)),
            pl.BlockSpec(fcslab.shape, lambda i: (0, 0)),
        ],
        out_specs=pl.BlockSpec((1, C, TB * N), lambda i: (i, 0, 0)),
        scratch_shapes=[
            pltpu.VMEM((TB * P1, C), f32),       # h1 (strided taps for conv2)
            pltpu.VMEM((TB * P2 + 8, C), f32),   # h2 (strided taps for conv3)
            pltpu.VMEM((TB * P3 + 8, C), f32),   # h3 (taps for conv4)
        ],
        compiler_params=pltpu.CompilerParams(
            dimension_semantics=("parallel",),
            vmem_limit_bytes=48 * 1024 * 1024),
        cost_estimate=cost,
    )(x2d, wslab, fcslab)

    # (steps, C, TB*N) -> (B, C, N)
    out = (out.reshape(steps, C, TB, N)
              .transpose(0, 2, 1, 3)
              .reshape(B_pad, C, N)[:B])
    if apply_softmax:
        out = jax.nn.softmax(out, axis=1)      # matches F.softmax(..., dim=1)
    return out


def _reference(x_ncl, params, apply_softmax=False):
    """Pure-JAX reference (lax.conv) with the same PyTorch semantics."""
    (w1, b1), (w2, b2), (w3, b3), (w4, b4), (fcw, fcb) = params

    def conv1d(x, w, b, stride):
        y = lax.conv_general_dilated(
            x, w, window_strides=(stride,), padding="VALID",
            dimension_numbers=("NCH", "OIH", "NCH"),
            precision=lax.Precision.HIGHEST)
        return jax.nn.elu(y + b[None, :, None])

    h = conv1d(x_ncl, w1, b1, 1)
    h = conv1d(h, w2, b2, 2)
    h = conv1d(h, w3, b3, 2)
    h = conv1d(h, w4, b4, 1)                               # (B, C, L4)
    pred = jnp.einsum("bcl,nl->bcn", h, fcw,
                      precision=lax.Precision.HIGHEST) + fcb[None, None, :]
    if apply_softmax:
        pred = jax.nn.softmax(pred, axis=1)
    return pred


if __name__ == "__main__":
    B = 2
    initial_num_channels = 8
    num_channels = 8
    num_classes = 4
    L = 46  # -> conv output length 8 == num_channels, as the fc layer requires

    key = jax.random.PRNGKey(0)
    ks = jax.random.split(key, 11)
    x = jax.random.normal(ks[0], (B, initial_num_channels, L), jnp.float32)

    def init(k, shape, scale):
        return (scale * jax.random.normal(k, shape)).astype(jnp.float32)

    params = (
        (init(ks[1], (num_channels, initial_num_channels, 3), 0.2),
         init(ks[2], (num_channels,), 0.1)),
        (init(ks[3], (num_channels, num_channels, 2), 0.2),
         init(ks[4], (num_channels,), 0.1)),
        (init(ks[5], (num_channels, num_channels, 3), 0.2),
         init(ks[6], (num_channels,), 0.1)),
        (init(ks[7], (num_channels, num_channels, 3), 0.2),
         init(ks[8], (num_channels,), 0.1)),
        (init(ks[9], (num_classes, num_channels), 0.2),
         init(ks[10], (num_classes,), 0.1)),
    )

    out = article_classifier_forward(x, params, apply_softmax=False)
    out = jax.block_until_ready(out)

    ref = _reference(x, params, apply_softmax=False)
    assert out.shape == (B, num_channels, num_classes), out.shape
    max_err = float(jnp.max(jnp.abs(out - ref)))
    assert jnp.allclose(out, ref, atol=2e-3, rtol=2e-3), max_err
    print("KERNEL_OK")
</pallas_src>

<mosaic_0001>
module attributes {stable_mosaic.version = 11 : i64} {
  func.func @kernel(%arg0: i32, %arg1: memref<128x8xf32, #tpu.memory_space<vmem>>, %arg2: memref<120x8xf32, #tpu.memory_space<vmem>>, %arg3: memref<33x8xf32, #tpu.memory_space<vmem>>, %arg4: memref<1x8x8xf32, #tpu.memory_space<vmem>>, %arg5: memref<128x8xf32, #tpu.memory_space<vmem>>, %arg6: memref<72x8xf32, #tpu.memory_space<vmem>>, %arg7: memref<40x8xf32, #tpu.memory_space<vmem>>) attributes {dimension_semantics = [#tpu.dimension_semantics<parallel>], iteration_bounds = array<i64: 1>, scalar_prefetch = 0 : i64, scratch_operands = 3 : i64, tpu.core_type = #tpu.core_type<tc>, window_params = [{transform_indices = @transform_0, window_bounds = array<i64: 128, 8>}, {pipeline_mode = #tpu.pipeline_mode<synchronous>, transform_indices = @transform_1, window_bounds = array<i64: 120, 8>}, {pipeline_mode = #tpu.pipeline_mode<synchronous>, transform_indices = @transform_2, window_bounds = array<i64: 33, 8>}, {transform_indices = @transform_3, window_bounds = array<i64: 1, 8, 8>}]} {
    %c0 = arith.constant 0 : index
    %c0_0 = arith.constant 0 : index
    %0 = vector.load %arg1[%c0, %c0_0] : memref<128x8xf32, #tpu.memory_space<vmem>>, vector<120x8xf32>
    %c1 = arith.constant 1 : index
    %c0_1 = arith.constant 0 : index
    %1 = vector.load %arg1[%c1, %c0_1] : memref<128x8xf32, #tpu.memory_space<vmem>>, vector<120x8xf32>
    %c2 = arith.constant 2 : index
    %c0_2 = arith.constant 0 : index
    %2 = vector.load %arg1[%c2, %c0_2] : memref<128x8xf32, #tpu.memory_space<vmem>>, vector<120x8xf32>
    %3 = tpu.concatenate %0, %1, %2 in 1 : vector<120x8xf32>, vector<120x8xf32>, vector<120x8xf32> -> vector<120x24xf32>
    %c0_3 = arith.constant 0 : index
    %c0_4 = arith.constant 0 : index
    %4 = vector.load %arg2[%c0_3, %c0_4] : memref<120x8xf32, #tpu.memory_space<vmem>>, vector<24x8xf32>
    %cst = arith.constant dense<0.000000e+00> : vector<120x8xf32>
    %5 = tpu.matmul %3, %4, %cst {dimension_numbers = #tpu.dot_dimension_numbers<[1], [0], [0], [1], [0, 0, 1, 1], [], []>} : vector<120x24xf32>, vector<24x8xf32>, vector<120x8xf32> -> vector<120x8xf32>
    %c24 = arith.constant 24 : index
    %c0_5 = arith.constant 0 : index
    %6 = vector.load %arg2[%c24, %c0_5] : memref<120x8xf32, #tpu.memory_space<vmem>>, vector<1x8xf32>
    %7 = vector.broadcast %6 : vector<1x8xf32> to vector<120x8xf32>
    %8 = arith.addf %5, %7 : vector<120x8xf32>
    %cst_6 = arith.constant 0.000000e+00 : f32
    %9 = vector.broadcast %cst_6 : f32 to vector<120x8xf32>
    %10 = arith.cmpf ogt, %8, %9 : vector<120x8xf32>
    %cst_7 = arith.constant 0.000000e+00 : f32
    %11 = vector.broadcast %cst_7 : f32 to vector<120x8xf32>
    %12 = arith.minimumf %8, %11 : vector<120x8xf32>
    %13 = math.exp %12 : vector<120x8xf32>
    %cst_8 = arith.constant 1.000000e+00 : f32
    %14 = vector.broadcast %cst_8 : f32 to vector<120x8xf32>
    %15 = arith.subf %13, %14 : vector<120x8xf32>
    %16 = arith.select %10, %8, %15 : vector<120x8xi1>, vector<120x8xf32>
    %c0_9 = arith.constant 0 : index
    %c0_10 = arith.constant 0 : index
    %17 = vector.load %arg5[%c0_9, %c0_10] : memref<128x8xf32, #tpu.memory_space<vmem>>, vector<120x8xf32>
    tpu.vector_store %arg5[%c0_9, %c0_10], %16 {strides = array<i32>} : memref<128x8xf32, #tpu.memory_space<vmem>>, vector<120x8xf32>,
    %cst_11 = arith.constant 0.000000e+00 : f32
    %18 = vector.broadcast %cst_11 : f32 to vector<8x8xf32>
    %c120 = arith.constant 120 : index
    %c0_12 = arith.constant 0 : index
    %19 = vector.load %arg5[%c120, %c0_12] : memref<128x8xf32, #tpu.memory_space<vmem>>, vector<8x8xf32>
    tpu.vector_store %arg5[%c120, %c0_12], %18 {strides = array<i32>} : memref<128x8xf32, #tpu.memory_space<vmem>>, vector<8x8xf32>,
    %c0_13 = arith.constant 0 : index
    %c0_14 = arith.constant 0 : index
    %20 = tpu.strided_load %arg5[%c0_13, %c0_14] {strides = array<i32: 2, 1>} : memref<128x8xf32, #tpu.memory_space<vmem>>, vector<64x8xf32>
    %c1_15 = arith.constant 1 : index
    %c0_16 = arith.constant 0 : index
    %21 = tpu.strided_load %arg5[%c1_15, %c0_16] {strides = array<i32: 2, 1>} : memref<128x8xf32, #tpu.memory_space<vmem>>, vector<64x8xf32>
    %22 = tpu.concatenate %20, %21 in 1 : vector<64x8xf32>, vector<64x8xf32> -> vector<64x16xf32>
    %c32 = arith.constant 32 : index
    %c0_17 = arith.constant 0 : index
    %23 = vector.load %arg2[%c32, %c0_17] : memref<120x8xf32, #tpu.memory_space<vmem>>, vector<16x8xf32>
    %cst_18 = arith.constant dense<0.000000e+00> : vector<64x8xf32>
    %24 = tpu.matmul %22, %23, %cst_18 {dimension_numbers = #tpu.dot_dimension_numbers<[1], [0], [0], [1], [0, 0, 1, 1], [], []>} : vector<64x16xf32>, vector<16x8xf32>, vector<64x8xf32> -> vector<64x8xf32>
    %c48 = arith.constant 48 : index
    %c0_19 = arith.constant 0 : index
    %25 = vector.load %arg2[%c48, %c0_19] : memref<120x8xf32, #tpu.memory_space<vmem>>, vector<1x8xf32>
    %26 = vector.broadcast %25 : vector<1x8xf32> to vector<64x8xf32>
    %27 = arith.addf %24, %26 : vector<64x8xf32>
    %cst_20 = arith.constant 0.000000e+00 : f32
    %28 = vector.broadcast %cst_20 : f32 to vector<64x8xf32>
    %29 = arith.cmpf ogt, %27, %28 : vector<64x8xf32>
    %cst_21 = arith.constant 0.000000e+00 : f32
    %30 = vector.broadcast %cst_21 : f32 to vector<64x8xf32>
    %31 = arith.minimumf %27, %30 : vector<64x8xf32>
    %32 = math.exp %31 : vector<64x8xf32>
    %cst_22 = arith.constant 1.000000e+00 : f32
    %33 = vector.broadcast %cst_22 : f32 to vector<64x8xf32>
    %34 = arith.subf %32, %33 : vector<64x8xf32>
    %35 = arith.select %29, %27, %34 : vector<64x8xi1>, vector<64x8xf32>
    %c0_23 = arith.constant 0 : index
    %c0_24 = arith.constant 0 : index
    %36 = vector.load %arg6[%c0_23, %c0_24] : memref<72x8xf32, #tpu.memory_space<vmem>>, vector<64x8xf32>
    tpu.vector_store %arg6[%c0_23, %c0_24], %35 {strides = array<i32>} : memref<72x8xf32, #tpu.memory_space<vmem>>, vector<64x8xf32>,
    %cst_25 = arith.constant 0.000000e+00 : f32
    %37 = vector.broadcast %cst_25 : f32 to vector<8x8xf32>
    %c64 = arith.constant 64 : index
    %c0_26 = arith.constant 0 : index
    %38 = vector.load %arg6[%c64, %c0_26] : memref<72x8xf32, #tpu.memory_space<vmem>>, vector<8x8xf32>
    tpu.vector_store %arg6[%c64, %c0_26], %37 {strides = array<i32>} : memref<72x8xf32, #tpu.memory_space<vmem>>, vector<8x8xf32>,
    %c0_27 = arith.constant 0 : index
    %c0_28 = arith.constant 0 : index
    %39 = tpu.strided_load %arg6[%c0_27, %c0_28] {strides = array<i32: 2, 1>} : memref<72x8xf32, #tpu.memory_space<vmem>>, vector<32x8xf32>
    %c1_29 = arith.constant 1 : index
    %c0_30 = arith.constant 0 : index
    %40 = tpu.strided_load %arg6[%c1_29, %c0_30] {strides = array<i32: 2, 1>} : memref<72x8xf32, #tpu.memory_space<vmem>>, vector<32x8xf32>
    %c2_31 = arith.constant 2 : index
    %c0_32 = arith.constant 0 : index
    %41 = tpu.strided_load %arg6[%c2_31, %c0_32] {strides = array<i32: 2, 1>} : memref<72x8xf32, #tpu.memory_space<vmem>>, vector<32x8xf32>
    %42 = tpu.concatenate %39, %40, %41 in 1 : vector<32x8xf32>, vector<32x8xf32>, vector<32x8xf32> -> vector<32x24xf32>
    %c56 = arith.constant 56 : index
    %c0_33 = arith.constant 0 : index
    %43 = vector.load %arg2[%c56, %c0_33] : memref<120x8xf32, #tpu.memory_space<vmem>>, vector<24x8xf32>
    %cst_34 = arith.constant dense<0.000000e+00> : vector<32x8xf32>
    %44 = tpu.matmul %42, %43, %cst_34 {dimension_numbers = #tpu.dot_dimension_numbers<[1], [0], [0], [1], [0, 0, 1, 1], [], []>} : vector<32x24xf32>, vector<24x8xf32>, vector<32x8xf32> -> vector<32x8xf32>
    %c80 = arith.constant 80 : index
    %c0_35 = arith.constant 0 : index
    %45 = vector.load %arg2[%c80, %c0_35] : memref<120x8xf32, #tpu.memory_space<vmem>>, vector<1x8xf32>
    %46 = vector.broadcast %45 : vector<1x8xf32> to vector<32x8xf32>
    %47 = arith.addf %44, %46 : vector<32x8xf32>
    %cst_36 = arith.constant 0.000000e+00 : f32
    %48 = vector.broadcast %cst_36 : f32 to vector<32x8xf32>
    %49 = arith.cmpf ogt, %47, %48 : vector<32x8xf32>
    %cst_37 = arith.constant 0.000000e+00 : f32
    %50 = vector.broadcast %cst_37 : f32 to vector<32x8xf32>
    %51 = arith.minimumf %47, %50 : vector<32x8xf32>
    %52 = math.exp %51 : vector<32x8xf32>
    %cst_38 = arith.constant 1.000000e+00 : f32
    %53 = vector.broadcast %cst_38 : f32 to vector<32x8xf32>
    %54 = arith.subf %52, %53 : vector<32x8xf32>
    %55 = arith.select %49, %47, %54 : vector<32x8xi1>, vector<32x8xf32>
    %c0_39 = arith.constant 0 : index
    %c0_40 = arith.constant 0 : index
    %56 = vector.load %arg7[%c0_39, %c0_40] : memref<40x8xf32, #tpu.memory_space<vmem>>, vector<32x8xf32>
    tpu.vector_store %arg7[%c0_39, %c0_40], %55 {strides = array<i32>} : memref<40x8xf32, #tpu.memory_space<vmem>>, vector<32x8xf32>,
    %cst_41 = arith.constant 0.000000e+00 : f32
    %57 = vector.broadcast %cst_41 : f32 to vector<8x8xf32>
    %c32_42 = arith.constant 32 : index
    %c0_43 = arith.constant 0 : index
    %58 = vector.load %arg7[%c32_42, %c0_43] : memref<40x8xf32, #tpu.memory_space<vmem>>, vector<8x8xf32>
    tpu.vector_store %arg7[%c32_42, %c0_43], %57 {strides = array<i32>} : memref<40x8xf32, #tpu.memory_space<vmem>>, vector<8x8xf32>,
    %c0_44 = arith.constant 0 : index
    %c0_45 = arith.constant 0 : index
    %59 = vector.load %arg7[%c0_44, %c0_45] : memref<40x8xf32, #tpu.memory_space<vmem>>, vector<32x8xf32>
    %c1_46 = arith.constant 1 : index
    %c0_47 = arith.constant 0 : index
    %60 = vector.load %arg7[%c1_46, %c0_47] : memref<40x8xf32, #tpu.memory_space<vmem>>, vector<32x8xf32>
    %c2_48 = arith.constant 2 : index
    %c0_49 = arith.constant 0 : index
    %61 = vector.load %arg7[%c2_48, %c0_49] : memref<40x8xf32, #tpu.memory_space<vmem>>, vector<32x8xf32>
    %62 = tpu.concatenate %59, %60, %61 in 1 : vector<32x8xf32>, vector<32x8xf32>, vector<32x8xf32> -> vector<32x24xf32>
    %c88 = arith.constant 88 : index
    %c0_50 = arith.constant 0 : index
    %63 = vector.load %arg2[%c88, %c0_50] : memref<120x8xf32, #tpu.memory_space<vmem>>, vector<24x8xf32>
    %cst_51 = arith.constant dense<0.000000e+00> : vector<32x8xf32>
    %64 = tpu.matmul %62, %63, %cst_51 {dimension_numbers = #tpu.dot_dimension_numbers<[1], [0], [0], [1], [0, 0, 1, 1], [], []>} : vector<32x24xf32>, vector<24x8xf32>, vector<32x8xf32> -> vector<32x8xf32>
    %c112 = arith.constant 112 : index
    %c0_52 = arith.constant 0 : index
    %65 = vector.load %arg2[%c112, %c0_52] : memref<120x8xf32, #tpu.memory_space<vmem>>, vector<1x8xf32>
    %66 = vector.broadcast %65 : vector<1x8xf32> to vector<32x8xf32>
    %67 = arith.addf %64, %66 : vector<32x8xf32>
    %cst_53 = arith.constant 0.000000e+00 : f32
    %68 = vector.broadcast %cst_53 : f32 to vector<32x8xf32>
    %69 = arith.cmpf ogt, %67, %68 : vector<32x8xf32>
    %cst_54 = arith.constant 0.000000e+00 : f32
    %70 = vector.broadcast %cst_54 : f32 to vector<32x8xf32>
    %71 = arith.minimumf %67, %70 : vector<32x8xf32>
    %72 = math.exp %71 : vector<32x8xf32>
    %cst_55 = arith.constant 1.000000e+00 : f32
    %73 = vector.broadcast %cst_55 : f32 to vector<32x8xf32>
    %74 = arith.subf %72, %73 : vector<32x8xf32>
    %75 = arith.select %69, %67, %74 : vector<32x8xi1>, vector<32x8xf32>
    %c0_56 = arith.constant 0 : index
    %c0_57 = arith.constant 0 : index
    %76 = vector.load %arg3[%c0_56, %c0_57] : memref<33x8xf32, #tpu.memory_space<vmem>>, vector<32x8xf32>
    %cst_58 = arith.constant dense<0.000000e+00> : vector<8x8xf32>
    %77 = tpu.matmul %75, %76, %cst_58 {dimension_numbers = #tpu.dot_dimension_numbers<[0], [0], [1], [1], [0, 1, 1, 1], [], []>} : vector<32x8xf32>, vector<32x8xf32>, vector<8x8xf32> -> vector<8x8xf32>
    %c32_59 = arith.constant 32 : index
    %c0_60 = arith.constant 0 : index
    %78 = vector.load %arg3[%c32_59, %c0_60] : memref<33x8xf32, #tpu.memory_space<vmem>>, vector<1x8xf32>
    %79 = vector.broadcast %78 : vector<1x8xf32> to vector<8x8xf32>
    %80 = arith.addf %77, %79 : vector<8x8xf32>
    %c0_61 = arith.constant 0 : index
    %c0_62 = arith.constant 0 : index
    %c0_63 = arith.constant 0 : index
    %81 = vector.load %arg4[%c0_61, %c0_62, %c0_63] : memref<1x8x8xf32, #tpu.memory_space<vmem>>, vector<1x8x8xf32>
    %82 = vector.shape_cast %81 : vector<1x8x8xf32> to vector<8x8xf32>
    %83 = vector.shape_cast %80 : vector<8x8xf32> to vector<1x8x8xf32>
    tpu.vector_store %arg4[%c0_61, %c0_62, %c0_63], %83 {strides = array<i32>} : memref<1x8x8xf32, #tpu.memory_space<vmem>>, vector<1x8x8xf32>,
    return
  }
  func.func @transform_0(%arg0: i32) -> (i32, i32) {
    %c0_i32 = arith.constant 0 : i32
    %c0_i32_0 = arith.constant 0 : i32
    return %arg0, %c0_i32 : i32, i32
  }
  func.func @transform_1(%arg0: i32) -> (i32, i32) {
    %c0_i32 = arith.constant 0 : i32
    %c0_i32_0 = arith.constant 0 : i32
    %c0_i32_1 = arith.constant 0 : i32
    return %c0_i32, %c0_i32_0 : i32, i32
  }
  func.func @transform_2(%arg0: i32) -> (i32, i32) {
    %c0_i32 = arith.constant 0 : i32
    %c0_i32_0 = arith.constant 0 : i32
    %c0_i32_1 = arith.constant 0 : i32
    return %c0_i32, %c0_i32_0 : i32, i32
  }
  func.func @transform_3(%arg0: i32) -> (i32, i32, i32) {
    %c0_i32 = arith.constant 0 : i32
    %c0_i32_0 = arith.constant 0 : i32
    %c0_i32_1 = arith.constant 0 : i32
    return %arg0, %c0_i32, %c0_i32_0 : i32, i32, i32
  }
}

</mosaic_0001>

<bundles_post_ra>
// kernel: tpu_custom_call.1
= control target key start
LH: loop header
LB: loop body
LE: loop exit
PB: predicated region body
PF: predicated region fallthrough
CT: control target
= control target key end

     0   :  { %s1618_s16 = smov 8   ;;  %vm180_vm0 = vcmask 64512   ;;  %v1619_v4 = vmov 0.0|0.0   ;;  %v1620_v5 = vmov 0.0   ;;  %vm1621_vm1 = vmmov 0   ;;  %s1622_s21 = smov 16   ;;  %s2089_s0 = inlined_call_operand.vmem [shape: f32[128,8], index: 0, kind: input, shape index: {}]   ;;  %s2090_s1 = inlined_call_operand.vmem [shape: f32[120,8], index: 1, kind: input, shape index: {}]   ;;  %s2091_s2 = inlined_call_operand.vmem [shape: f32[33,8], index: 2, kind: input, shape index: {}]   ;;  %s2092_s3 = inlined_call_operand.hbm [shape: f32[1,8,8], index: 3, kind: output, shape index: {}]  }
   0x1   :  { %v31_v0 = vld [vmem:[%s2089_s0 + $0x9] sm:$0xff]  ;;  %v30_v1 = vld [vmem:[%s2089_s0 + $0x1] sm:$0xff]  ;;  %1501 = vmatprep.subr.bf16.mxu0 %v1619_v4  ;;  %511 = vst.msk [vmem:[#allocation2 + $0x78] sm:$0xff] %vm180_vm0, %v1620_v5  ;;  %775 = vst.msk [vmem:[#allocation3 + $0x40] sm:$0xff] %vm180_vm0, %v1620_v5  ;;  %1405 = vmatprep.mubr.msk.f32.mxu0 %vm1621_vm1, %v1620_v5 }
   0x2   :  { %77 = vrot.lane.b32.xlu1 %v31_v0, %s1618_s16  ;;  %75 = vrot.lane.b32.xlu0 %v30_v1, %s1618_s16  ;;  %v46_v2 = vld [vmem:[%s2089_s0 + $0xa] sm:$0xff]  ;;  %v45_v3 = vld [vmem:[%s2089_s0 + $0x2] sm:$0xff]  ;;  %972 = vst.msk [vmem:[#allocation4 + $0x20] sm:$0xff] %vm180_vm0, %v1620_v5 }
   0x3   :  { %1522 = vmatprep.subr.bf16.mxu1 %v1619_v4  ;;  %1441 = vmatprep.mubr.msk.f32.mxu1 %vm1621_vm1, %v1620_v5  ;;  %v47_v6 = vld [vmem:[%s2089_s0 + $0x12] sm:$0xff]  ;;  %v48_v8 = vld [vmem:[%s2089_s0 + $0x1a] sm:$0xff]  ;;  %v213_v11 = vld [vmem:[%s2090_s1 + $0x8] sm:$0xff] }
   0x4   :  { %v32_v7 = vld [vmem:[%s2089_s0 + $0x11] sm:$0xff]  ;;  %v33_v9 = vld [vmem:[%s2089_s0 + $0x19] sm:$0xff]  ;;  %v49_v13 = vld [vmem:[%s2089_s0 + $0x22] sm:$0xff] }
   0x5   :  { %v212_v10 = vld [vmem:[%s2090_s1] sm:$0xff] }
   0x6   :  { %137 = vrot.lane.b32.xlu1 %v46_v2, %s1622_s21  ;;  %135 = vrot.lane.b32.xlu0 %v45_v3, %s1622_s21  ;;  %v1502_v12 = vpack.c.bf16 %v213_v11, %v212_v10  ;;  %v34_v14 = vld [vmem:[%s2089_s0 + $0x21] sm:$0xff] }
   0xa   :  { %139 = vrot.lane.b32.xlu1 %v47_v6, %s1622_s21  ;;  %79 = vrot.lane.b32.xlu0 %v32_v7, %s1618_s16 }
   0xe   :  { %141 = vrot.lane.b32.xlu1 %v48_v8, %s1622_s21  ;;  %81 = vrot.lane.b32.xlu0 %v33_v9, %s1618_s16 }
   0xf   :  { %8 = vsyncpa [#allocation6], 0  ;;  %1503 = vmatpush3.bf16.msra.mxu0 %v1502_v12  ;;  %1524 = vmatpush3.bf16.msra.mxu1 %v1502_v12  ;;  %v214_v15 = vld [vmem:[%s2090_s1 + $0x10] sm:$0xff]  ;;  %v52_v20 = vld [vmem:[%s2089_s0 + $0x3a] sm:$0xff]  ;;  %vm196_vm2 = vcmask 130048   ;;  %vm220_vm3 = vcmask 195584  }
  0x10   :  { %1403 = vmatprep.subr.mxu0 %v1620_v5  ;;  %1523 = vmatprep.subr.mxu1 %v1620_v5  ;;  %v50_v16 = vld [vmem:[%s2089_s0 + $0x2a] sm:$0xff]  ;;  %v51_v18 = vld [vmem:[%s2089_s0 + $0x32] sm:$0xff]  ;;  %v53_v22 = vld [vmem:[%s2089_s0 + $0x42] sm:$0xff]  ;;  %s1623_s12 = smov [#allocation5]  }
  0x11   :  { %v35_v17 = vld [vmem:[%s2089_s0 + $0x29] sm:$0xff]  ;;  %v36_v19 = vld [vmem:[%s2089_s0 + $0x31] sm:$0xff]  ;;  %v37_v21 = vld [vmem:[%s2089_s0 + $0x39] sm:$0xff]  ;;  %s1276_s13 = sshll.u32 %s1623_s12, 4  ;;  %s1277_s13 = int_to_ptr.vmem [resolvable:$true] %s1276_s13 }
  0x12   :  { %143 = vrot.lane.b32.xlu1 %v49_v13, %s1622_s21  ;;  %83 = vrot.lane.b32.xlu0 %v34_v14, %s1618_s16  ;;  %v38_v23 = vld [vmem:[%s2089_s0 + $0x41] sm:$0xff]  ;;  %v54_v24 = vld [vmem:[%s2089_s0 + $0x4a] sm:$0xff]  ;;  %s1594_s14 = scalar_lea.vmem %s1277_s13, 128  ;;  %p1599_p1 = scmp.lt.s32.totalorder %s1277_s13, %s1277_s13 }
  0x13   :  { %1404 = vmatpush3.msra.mxu0 %v214_v15  ;;  %1525 = vmatpush3.msra.mxu1 %v214_v15  ;;  %v39_v25 = vld [vmem:[%s2089_s0 + $0x49] sm:$0xff]  ;;  %v42_v26 = vld [vmem:[%s2089_s0 + $0x61] sm:$0xff]  ;;  %v40_v27 = vld [vmem:[%s2089_s0 + $0x51] sm:$0xff]  ;;  %p1595_p0 = scmp.ne.s32.totalorder %s1277_s13, %s1594_s14  ;;  %p1600_p2 = scmp.lt.s32.totalorder %s1594_s14, %s1594_s14 }
  0x14   :  { %v57_v28 = vld [vmem:[%s2089_s0 + $0x62] sm:$0xff]  ;;  %v55_v29 = vld [vmem:[%s2089_s0 + $0x52] sm:$0xff]  ;;  %v58_v32 = vld [vmem:[%s2089_s0 + $0x6a] sm:$0xff] }
  0x15   :  { %v43_v30 = vld [vmem:[%s2089_s0 + $0x69] sm:$0xff]  ;;  %v41_v31 = vld [vmem:[%s2089_s0 + $0x59] sm:$0xff]  ;;  %v44_v34 = vld [vmem:[%s2089_s0 + $0x71] sm:$0xff]  ;;  %p1601_p3 = por %p1600_p2, %p1599_p1 }
  0x16   :  { %145 = vrot.lane.b32.xlu1 %v50_v16, %s1622_s21  ;;  %85 = vrot.lane.b32.xlu0 %v35_v17, %s1618_s16  ;;  %v56_v33 = vld [vmem:[%s2089_s0 + $0x5a] sm:$0xff]  ;;  %v59_v35 = vld [vmem:[%s2089_s0 + $0x72] sm:$0xff] }
  0x17   :  { %v15_v38 = vld [vmem:[%s2089_s0] sm:$0xff]  ;;  %v16_v42 = vld [vmem:[%s2089_s0 + $0x8] sm:$0xff]  ;;  %v17_v44 = vld [vmem:[%s2089_s0 + $0x10] sm:$0xff]  ;;  %p1602_p4 = pnand %p1601_p3, %p1595_p0 }
  0x18   :  { %v18_v50 = vld [vmem:[%s2089_s0 + $0x18] sm:$0xff]  ;;  %v19_v55 = vld [vmem:[%s2089_s0 + $0x20] sm:$0xff]  ;;  %v20_v60 = vld [vmem:[%s2089_s0 + $0x28] sm:$0xff] }
  0x19   :  { %v21_v1 = vld [vmem:[%s2089_s0 + $0x30] sm:$0xff]  ;;  %v22_v8 = vld [vmem:[%s2089_s0 + $0x38] sm:$0xff]  ;;  %v23_v13 = vld [vmem:[%s2089_s0 + $0x40] sm:$0xff] }
  0x1a   :  { %147 = vrot.lane.b32.xlu1 %v51_v18, %s1622_s21  ;;  %87 = vrot.lane.b32.xlu0 %v36_v19, %s1618_s16  ;;  %v24_v18 = vld [vmem:[%s2089_s0 + $0x48] sm:$0xff] }
  0x1e   :  { %149 = vrot.lane.b32.xlu1 %v52_v20, %s1622_s21  ;;  %89 = vrot.lane.b32.xlu0 %v37_v21, %s1618_s16 }
  0x22   :  { %151 = vrot.lane.b32.xlu1 %v53_v22, %s1622_s21  ;;  %91 = vrot.lane.b32.xlu0 %v38_v23, %s1618_s16 }
  0x26   :  { %153 = vrot.lane.b32.xlu1 %v54_v24, %s1622_s21  ;;  %93 = vrot.lane.b32.xlu0 %v39_v25, %s1618_s16  ;;  %v27_v25 = vld [vmem:[%s2089_s0 + $0x60] sm:$0xff] }
  0x2a   :  { %99 = vrot.lane.b32.xlu1 %v42_v26, %s1618_s16  ;;  %95 = vrot.lane.b32.xlu0 %v40_v27, %s1618_s16  ;;  %v25_v26 = vld [vmem:[%s2089_s0 + $0x50] sm:$0xff] }
  0x2e   :  { %159 = vrot.lane.b32.xlu1 %v57_v28, %s1622_s21  ;;  %155 = vrot.lane.b32.xlu0 %v55_v29, %s1622_s21 }
  0x32   :  { %101 = vrot.lane.b32.xlu1 %v43_v30, %s1618_s16  ;;  %97 = vrot.lane.b32.xlu0 %v41_v31, %s1618_s16 }
  0x36   :  { %161 = vrot.lane.b32.xlu1 %v58_v32, %s1622_s21  ;;  %157 = vrot.lane.b32.xlu0 %v56_v33, %s1622_s21 }
  0x3a   :  { %103 = vrot.lane.b32.xlu0 %v44_v34, %s1618_s16  ;;  %163 = vrot.lane.b32.xlu1 %v59_v35, %s1622_s21 }
  0x74   :  { %v78_v36 = vpop.permute.xlu1 %77  ;;  %v76_v37 = vpop.permute.xlu0 %75 }
  0x75   :  { %v181_v39 = vsel %vm180_vm0, %v15_v38, %v76_v37  ;;  %v182_v45 = vsel %vm180_vm0, %v16_v42, %v78_v36  ;;  %v28_v36 = vld [vmem:[%s2089_s0 + $0x68] sm:$0xff]  ;;  %v26_v37 = vld [vmem:[%s2089_s0 + $0x58] sm:$0xff] }
  0x78   :  { %v138_v40 = vpop.permute.xlu1 %137  ;;  %v136_v41 = vpop.permute.xlu0 %135 }
  0x79   :  { %v197_v43 = vsel %vm196_vm2, %v181_v39, %v136_v41  ;;  %v198_v48 = vsel %vm196_vm2, %v182_v45, %v138_v40 }
  0x7a   :  { %1406 = vmatmul.mubr.msk.f32.vlgmr.msra.gmra.mrb[0].mxu0 %vm220_vm3, %v197_v43 }
  0x7b   :  { %1408 = vmatprep.mubr.msk.f32.mxu0 %vm1621_vm1, %v1620_v5 }
  0x7c   :  { %v140_v46 = vpop.permute.xlu1 %139  ;;  %v80_v47 = vpop.permute.xlu0 %79 }
  0x7d   :  { %v183_v49 = vsel %vm180_vm0, %v17_v44, %v80_v47  ;;  %v29_v44 = vld [vmem:[%s2089_s0 + $0x70] sm:$0xff] }
  0x7e   :  { %1409 = vmatmul.mubr.msk.f32.gmra.mrb[2].mxu0 %vm220_vm3, %v198_v48  ;;  %v199_v53 = vsel %vm196_vm2, %v183_v49, %v140_v46  ;;  %v1906_v49 = vld [vmem:[%s2090_s1 + $0x18] ss:$0 sm:$0xff] }
  0x7f   :  { %1411 = vmatprep.mubr.msk.f32.mxu0 %vm1621_vm1, %v1620_v5 }
  0x80   :  { %v142_v51 = vpop.permute.xlu1 %141  ;;  %v82_v52 = vpop.permute.xlu0 %81 }
  0x81   :  { %v184_v54 = vsel %vm180_vm0, %v18_v50, %v82_v52 }
  0x82   :  { %1412 = vmatmul.mubr.msk.f32.gmra.mrb[4].mxu0 %vm220_vm3, %v199_v53  ;;  %v200_v58 = vsel %vm196_vm2, %v184_v54, %v142_v51 }
  0x83   :  { %1414 = vmatprep.mubr.msk.f32.mxu0 %vm1621_vm1, %v1620_v5 }
  0x84   :  { %v144_v56 = vpop.permute.xlu1 %143  ;;  %v84_v57 = vpop.permute.xlu0 %83 }
  0x85   :  { %v185_v59 = vsel %vm180_vm0, %v19_v55, %v84_v57 }
  0x86   :  { %1415 = vmatmul.mubr.msk.f32.gmra.mrb[6].mxu0 %vm220_vm3, %v200_v58  ;;  %v201_v63 = vsel %vm196_vm2, %v185_v59, %v144_v56 }
  0x87   :  { %1417 = vmatprep.mubr.msk.f32.mxu0 %vm1621_vm1, %v1620_v5 }
  0x88   :  { %v146_v61 = vpop.permute.xlu1 %145  ;;  %v86_v62 = vpop.permute.xlu0 %85 }
  0x89   :  { %v186_v0 = vsel %vm180_vm0, %v20_v60, %v86_v62 }
  0x8a   :  { %1418 = vmatmul.mubr.msk.f32.gmra.mrb[8].mxu0 %vm220_vm3, %v201_v63  ;;  %v202_v6 = vsel %vm196_vm2, %v186_v0, %v146_v61 }
  0x8b   :  { %1420 = vmatprep.mubr.msk.f32.mxu0 %vm1621_vm1, %v1620_v5 }
  0x8c   :  { %v148_v2 = vpop.permute.xlu1 %147  ;;  %v88_v3 = vpop.permute.xlu0 %87 }
  0x8d   :  { %v187_v7 = vsel %vm180_vm0, %v21_v1, %v88_v3 }
  0x8e   :  { %1421 = vmatmul.mubr.msk.f32.gmra.mrb[10].mxu0 %vm220_vm3, %v202_v6  ;;  %v203_v11 = vsel %vm196_vm2, %v187_v7, %v148_v2 }
  0x8f   :  { %1423 = vmatprep.mubr.msk.f32.mxu0 %vm1621_vm1, %v1620_v5 }
  0x90   :  { %v150_v9 = vpop.permute.xlu1 %149  ;;  %v90_v10 = vpop.permute.xlu0 %89 }
  0x91   :  { %v188_v12 = vsel %vm180_vm0, %v22_v8, %v90_v10 }
  0x92   :  { %1424 = vmatmul.mubr.msk.f32.gmra.mrb[12].mxu0 %vm220_vm3, %v203_v11  ;;  %v204_v16 = vsel %vm196_vm2, %v188_v12, %v150_v9 }
  0x93   :  { %1426 = vmatprep.mubr.msk.f32.mxu0 %vm1621_vm1, %v1620_v5 }
  0x94   :  { %v152_v14 = vpop.permute.xlu1 %151  ;;  %v92_v15 = vpop.permute.xlu0 %91 }
  0x95   :  { %v189_v17 = vsel %vm180_vm0, %v23_v13, %v92_v15 }
  0x96   :  { %1427 = vmatmul.mubr.msk.f32.gmra.mrb[14].mxu0 %vm220_vm3, %v204_v16  ;;  %v205_v21 = vsel %vm196_vm2, %v189_v17, %v152_v14 }
  0x97   :  { %1429 = vmatprep.mubr.msk.f32.mxu0 %vm1621_vm1, %v1620_v5 }
  0x98   :  { %v154_v19 = vpop.permute.xlu1 %153  ;;  %v94_v20 = vpop.permute.xlu0 %93 }
  0x99   :  { %v190_v22 = vsel %vm180_vm0, %v24_v18, %v94_v20  ;;  %v583_v20 = vld [vmem:[%s2090_s1 + $0x20] sm:$0xff] }
  0x9a   :  { %1430 = vmatmul.mubr.msk.f32.gmra.mrb[16].mxu0 %vm220_vm3, %v205_v21  ;;  %v206_v27 = vsel %vm196_vm2, %v190_v22, %v154_v19  ;;  %v584_v21 = vld [vmem:[%s2090_s1 + $0x28] sm:$0xff] }
  0x9b   :  { %1432 = vmatprep.mubr.msk.f32.mxu0 %vm1621_vm1, %v1620_v5 }
  0x9c   :  { %v100_v23 = vpop.permute.xlu1 %99  ;;  %v96_v24 = vpop.permute.xlu0 %95 }
  0x9d   :  { %v193_v28 = vsel %vm180_vm0, %v27_v25, %v100_v23  ;;  %v191_v29 = vsel %vm180_vm0, %v25_v26, %v96_v24  ;;  %v1504_v23 = vpack.c.bf16 %v584_v21, %v583_v20 }
  0x9e   :  { %1433 = vmatmul.mubr.msk.f32.gmra.mrb[18].mxu0 %vm220_vm3, %v206_v27 }
  0x9f   :  { %1435 = vmatprep.mubr.msk.f32.mxu0 %vm1621_vm1, %v1620_v5  ;;  %1505 = vmatprep.subr.bf16.mxu1 %v1504_v23 }
  0xa0   :  { %v160_v30 = vpop.permute.xlu1 %159  ;;  %v156_v31 = vpop.permute.xlu0 %155 }
  0xa1   :  { %v209_v32 = vsel %vm196_vm2, %v193_v28, %v160_v30  ;;  %v207_v33 = vsel %vm196_vm2, %v191_v29, %v156_v31 }
  0xa2   :  { %1436 = vmatmul.mubr.msk.f32.gmra.mrb[20].mxu0 %vm220_vm3, %v207_v33  ;;  %1442 = vmatmul.mubr.msk.f32.vlgmr.msra.gmra.mrb[0].mxu1 %vm220_vm3, %v209_v32 }
  0xa3   :  { %1438 = vmatprep.mubr.msk.f32.mxu0 %vm1621_vm1, %v1620_v5  ;;  %1444 = vmatprep.mubr.msk.f32.mxu1 %vm1621_vm1, %v1620_v5 }
  0xa4   :  { %v102_v34 = vpop.permute.xlu1 %101  ;;  %v98_v35 = vpop.permute.xlu0 %97  ;;  %1507 = vmatpush3.bf16.msra.mxu1 %v1504_v23 }
  0xa5   :  { %v194_v38 = vsel %vm180_vm0, %v28_v36, %v102_v34  ;;  %v192_v39 = vsel %vm180_vm0, %v26_v37, %v98_v35 }
  0xa8   :  { %v162_v40 = vpop.permute.xlu1 %161  ;;  %v158_v41 = vpop.permute.xlu0 %157 }
  0xa9   :  { %v210_v42 = vsel %vm196_vm2, %v194_v38, %v162_v40  ;;  %v208_v43 = vsel %vm196_vm2, %v192_v39, %v158_v41 }
  0xaa   :  { %1439 = vmatmul.mubr.msk.f32.gmra.mrb[22].mxu0 %vm220_vm3, %v208_v43  ;;  %1445 = vmatmul.mubr.msk.f32.gmra.mrb[2].mxu1 %vm220_vm3, %v210_v42 }
  0xab   :  { %1447 = vmatprep.mubr.msk.f32.mxu1 %vm1621_vm1, %v1620_v5 }
  0xac   :  { %v104_v45 = vpop.permute.xlu0 %103  ;;  %v164_v46 = vpop.permute.xlu1 %163 }
  0xad   :  { %v195_v47 = vsel %vm180_vm0, %v29_v44, %v104_v45 }
  0xae   :  { %v211_v48 = vsel %vm196_vm2, %v195_v47, %v164_v46 }
  0xaf   :  { %1448 = vmatmul.mubr.msk.f32.gmra.mrb[4].mxu1 %vm220_vm3, %v211_v48 }
 0x14d   :  { %v332_v50 = vpop.f32.mrb[0].mxu0 }
 0x14e   :  { %v333_v51 = vadd.f32 %v1906_v49, %v332_v50  ;;  %v1407_v52 = vpop.f32.mrb[1].mxu0 }
 0x150   :  { %v421_v53 = vmin.f32 %v333_v51, 0.0  ;;  %vm406_vm4 = vcmp.gt.f32.partialorder %v333_v51, 0.0 }
 0x151   :  { %v337_v54 = vpop.f32.mrb[2].mxu0 }
 0x152   :  { %v436_v55 = vmul.f32 1.442695, %v421_v53  ;;  %v338_v56 = vadd.f32 %v1906_v49, %v337_v54  ;;  %v1410_v57 = vpop.f32.mrb[3].mxu0 }
 0x154   :  { %1532 = vpow2.f32 %v436_v55  ;;  %v422_v58 = vmin.f32 %v338_v56, 0.0  ;;  %vm407_vm5 = vcmp.gt.f32.partialorder %v338_v56, 0.0 }
 0x155   :  { %v342_v59 = vpop.f32.mrb[4].mxu0 }
 0x156   :  { %v438_v60 = vmul.f32 1.442695, %v422_v58  ;;  %v343_v61 = vadd.f32 %v1906_v49, %v342_v59  ;;  %v1413_v62 = vpop.f32.mrb[5].mxu0 }
 0x158   :  { %1534 = vpow2.f32 %v438_v60  ;;  %v423_v63 = vmin.f32 %v343_v61, 0.0  ;;  %vm408_vm6 = vcmp.gt.f32.partialorder %v343_v61, 0.0 }
 0x159   :  { %v347_v0 = vpop.f32.mrb[6].mxu0 }
 0x15a   :  { %v440_v1 = vmul.f32 1.442695, %v423_v63  ;;  %v348_v2 = vadd.f32 %v1906_v49, %v347_v0  ;;  %v1416_v3 = vpop.f32.mrb[7].mxu0 }
 0x15c   :  { %1536 = vpow2.f32 %v440_v1  ;;  %v424_v6 = vmin.f32 %v348_v2, 0.0  ;;  %vm409_vm7 = vcmp.gt.f32.partialorder %v348_v2, 0.0 }
 0x15d   :  { %v352_v7 = vpop.f32.mrb[8].mxu0 }
 0x15e   :  { %v1533_v8 = vpop.eup %1532  ;;  %v442_v9 = vmul.f32 1.442695, %v424_v6  ;;  %v353_v10 = vadd.f32 %v1906_v49, %v352_v7  ;;  %v1419_v11 = vpop.f32.mrb[9].mxu0 }
 0x15f   :  { %v1300_v12 = vadd.f32 -1.0, %v1533_v8 }
 0x160   :  { %1538 = vpow2.f32 %v442_v9  ;;  %v425_v13 = vmin.f32 %v353_v10, 0.0  ;;  %vm410_vm8 = vcmp.gt.f32.partialorder %v353_v10, 0.0 }
 0x161   :  { %v481_v14 = vsel %vm406_vm4, %v333_v51, %v1300_v12  ;;  %v357_v15 = vpop.f32.mrb[10].mxu0 }
 0x162   :  { %v1535_v16 = vpop.eup %1534  ;;  %496 = vst.msk [vmem:[#allocation2] sm:$0xff] %vm180_vm0, %v481_v14  ;;  %v444_v17 = vmul.f32 1.442695, %v425_v13  ;;  %v358_v18 = vadd.f32 %v1906_v49, %v357_v15  ;;  %v1422_v19 = vpop.f32.mrb[11].mxu0 }
 0x163   :  { %v1301_v22 = vadd.f32 -1.0, %v1535_v16 }
 0x164   :  { %1540 = vpow2.f32 %v444_v17  ;;  %v426_v24 = vmin.f32 %v358_v18, 0.0  ;;  %vm411_vm9 = vcmp.gt.f32.partialorder %v358_v18, 0.0 }
 0x165   :  { %v482_v25 = vsel %vm407_vm5, %v338_v56, %v1301_v22  ;;  %v362_v26 = vpop.f32.mrb[12].mxu0 }
 0x166   :  { %v1537_v27 = vpop.eup %1536  ;;  %497 = vst.msk [vmem:[#allocation2 + $0x8] sm:$0xff] %vm180_vm0, %v482_v25  ;;  %v446_v28 = vmul.f32 1.442695, %v426_v24  ;;  %v363_v29 = vadd.f32 %v1906_v49, %v362_v26  ;;  %v1425_v30 = vpop.f32.mrb[13].mxu0 }
 0x167   :  { %v1302_v31 = vadd.f32 -1.0, %v1537_v27 }
 0x168   :  { %1542 = vpow2.f32 %v446_v28  ;;  %v427_v32 = vmin.f32 %v363_v29, 0.0  ;;  %vm412_vm10 = vcmp.gt.f32.partialorder %v363_v29, 0.0 }
 0x169   :  { %v483_v33 = vsel %vm408_vm6, %v343_v61, %v1302_v31  ;;  %v367_v34 = vpop.f32.mrb[14].mxu0 }
 0x16a   :  { %v1539_v35 = vpop.eup %1538  ;;  %498 = vst.msk [vmem:[#allocation2 + $0x10] sm:$0xff] %vm180_vm0, %v483_v33  ;;  %v448_v36 = vmul.f32 1.442695, %v427_v32  ;;  %v368_v37 = vadd.f32 %v1906_v49, %v367_v34  ;;  %v1428_v38 = vpop.f32.mrb[15].mxu0 }
 0x16b   :  { %v1303_v39 = vadd.f32 -1.0, %v1539_v35 }
 0x16c   :  { %1544 = vpow2.f32 %v448_v36  ;;  %v428_v40 = vmin.f32 %v368_v37, 0.0  ;;  %vm413_vm11 = vcmp.gt.f32.partialorder %v368_v37, 0.0 }
 0x16d   :  { %v484_v41 = vsel %vm409_vm7, %v348_v2, %v1303_v39  ;;  %v372_v42 = vpop.f32.mrb[16].mxu0  ;;  %v528_v43 = vld [vmem:[#allocation2 + $0x1] ss:$2 sm:$0xff] }
 0x16e   :  { %v1541_v44 = vpop.eup %1540  ;;  %499 = vst.msk [vmem:[#allocation2 + $0x18] sm:$0xff] %vm180_vm0, %v484_v41  ;;  %v450_v45 = vmul.f32 1.442695, %v428_v40  ;;  %v373_v46 = vadd.f32 %v1906_v49, %v372_v42  ;;  %551 = vrot.lane.b32.xlu0 %v528_v43, %s1618_s16  ;;  %v1431_v47 = vpop.f32.mrb[17].mxu0 }
 0x16f   :  { %v1304_v48 = vadd.f32 -1.0, %v1541_v44 }
 0x170   :  { %1546 = vpow2.f32 %v450_v45  ;;  %v429_v50 = vmin.f32 %v373_v46, 0.0  ;;  %vm414_vm12 = vcmp.gt.f32.partialorder %v373_v46, 0.0 }
 0x171   :  { %v485_v51 = vsel %vm410_vm8, %v353_v10, %v1304_v48  ;;  %v377_v52 = vpop.f32.mrb[18].mxu0 }
 0x172   :  { %v1543_v53 = vpop.eup %1542  ;;  %500 = vst.msk [vmem:[#allocation2 + $0x20] sm:$0xff] %vm180_vm0, %v485_v51  ;;  %v452_v54 = vmul.f32 1.442695, %v429_v50  ;;  %v378_v55 = vadd.f32 %v1906_v49, %v377_v52  ;;  %v1434_v56 = vpop.f32.mrb[19].mxu0 }
 0x173   :  { %v1305_v57 = vadd.f32 -1.0, %v1543_v53 }
 0x174   :  { %1548 = vpow2.f32 %v452_v54  ;;  %v430_v58 = vmin.f32 %v378_v55, 0.0  ;;  %vm415_vm13 = vcmp.gt.f32.partialorder %v378_v55, 0.0 }
 0x175   :  { %v486_v59 = vsel %vm411_vm9, %v358_v18, %v1305_v57  ;;  %v382_v60 = vpop.f32.mrb[20].mxu0  ;;  %v392_v61 = vpop.f32.mrb[0].mxu1  ;;  %v530_v62 = vld [vmem:[#allocation2 + $0x11] ss:$2 sm:$0xff] }
 0x176   :  { %v1545_v63 = vpop.eup %1544  ;;  %501 = vst.msk [vmem:[#allocation2 + $0x28] sm:$0xff] %vm180_vm0, %v486_v59  ;;  %v454_v0 = vmul.f32 1.442695, %v430_v58  ;;  %v383_v1 = vadd.f32 %v1906_v49, %v382_v60  ;;  %v393_v2 = vadd.f32 %v1906_v49, %v392_v61  ;;  %v1443_v3 = vpop.f32.mrb[1].mxu1  ;;  %553 = vrot.lane.b32.xlu1 %v530_v62, %s1618_s16  ;;  %v512_v59 = vld [vmem:[#allocation2] ss:$2 sm:$0xff] }
 0x177   :  { %v1437_v6 = vpop.f32.mrb[21].mxu0  ;;  %v1306_v7 = vadd.f32 -1.0, %v1545_v63  ;;  %v514_v62 = vld [vmem:[#allocation2 + $0x10] ss:$2 sm:$0xff] }
 0x178   :  { %1550 = vpow2.f32 %v454_v0  ;;  %v431_v8 = vmin.f32 %v383_v1, 0.0  ;;  %v433_v10 = vmin.f32 %v393_v2, 0.0  ;;  %vm416_vm14 = vcmp.gt.f32.partialorder %v383_v1, 0.0 }
 0x179   :  { %v487_v9 = vsel %vm412_vm10, %v363_v29, %v1306_v7  ;;  %vm418_vm15 = vcmp.gt.f32.partialorder %v393_v2, 0.0 }
 0x17a   :  { %v1547_v11 = vpop.eup %1546  ;;  %502 = vst.msk [vmem:[#allocation2 + $0x30] sm:$0xff] %vm180_vm0, %v487_v9  ;;  %v456_v12 = vmul.f32 1.442695, %v431_v8  ;;  %v460_v14 = vmul.f32 1.442695, %v433_v10 }
 0x17b   :  { %v1307_v13 = vadd.f32 -1.0, %v1547_v11 }
 0x17c   :  { %1552 = vpow2.f32 %v456_v12 }
 0x17d   :  { %v488_v15 = vsel %vm413_vm11, %v368_v37, %v1307_v13  ;;  %1554 = vpow2.f32 %v460_v14  ;;  %v387_v16 = vpop.f32.mrb[22].mxu0  ;;  %v397_v17 = vpop.f32.mrb[2].mxu1  ;;  %v532_v18 = vld [vmem:[#allocation2 + $0x21] ss:$2 sm:$0xff] }
 0x17e   :  { %v1549_v19 = vpop.eup %1548  ;;  %503 = vst.msk [vmem:[#allocation2 + $0x38] sm:$0xff] %vm180_vm0, %v488_v15  ;;  %v388_v20 = vadd.f32 %v1906_v49, %v387_v16  ;;  %v398_v21 = vadd.f32 %v1906_v49, %v397_v17  ;;  %v1446_v22 = vpop.f32.mrb[3].mxu1  ;;  %555 = vrot.lane.b32.xlu0 %v532_v18, %s1618_s16 }
 0x17f   :  { %v1440_v23 = vpop.f32.mrb[23].mxu0  ;;  %v1308_v24 = vadd.f32 -1.0, %v1549_v19 }
 0x180   :  { %v432_v25 = vmin.f32 %v388_v20, 0.0  ;;  %v434_v26 = vmin.f32 %v398_v21, 0.0  ;;  %vm417_vm4 = vcmp.gt.f32.partialorder %v388_v20, 0.0  ;;  %vm419_vm5 = vcmp.gt.f32.partialorder %v398_v21, 0.0 }
 0x181   :  { %v489_v27 = vsel %vm414_vm12, %v373_v46, %v1308_v24 }
 0x182   :  { %v1551_v28 = vpop.eup %1550  ;;  %504 = vst.msk [vmem:[#allocation2 + $0x40] sm:$0xff] %vm180_vm0, %v489_v27  ;;  %v458_v29 = vmul.f32 1.442695, %v432_v25  ;;  %v462_v30 = vmul.f32 1.442695, %v434_v26  ;;  %v402_v31 = vpop.f32.mrb[4].mxu1 }
 0x183   :  { %v1309_v32 = vadd.f32 -1.0, %v1551_v28  ;;  %v403_v33 = vadd.f32 %v1906_v49, %v402_v31  ;;  %v1449_v34 = vpop.f32.mrb[5].mxu1 }
 0x184   :  { %1556 = vpow2.f32 %v458_v29 }
 0x185   :  { %v490_v35 = vsel %vm415_vm13, %v378_v55, %v1309_v32  ;;  %1558 = vpow2.f32 %v462_v30  ;;  %v435_v36 = vmin.f32 %v403_v33, 0.0  ;;  %v534_v37 = vld [vmem:[#allocation2 + $0x31] ss:$2 sm:$0xff]  ;;  %vm420_vm6 = vcmp.gt.f32.partialorder %v403_v33, 0.0  ;;  %v518_v6 = vld [vmem:[#allocation2 + $0x30] ss:$2 sm:$0xff] }
 0x186   :  { %v1553_v38 = vpop.eup %1552  ;;  %505 = vst.msk [vmem:[#allocation2 + $0x48] sm:$0xff] %vm180_vm0, %v490_v35  ;;  %557 = vrot.lane.b32.xlu1 %v534_v37, %s1618_s16 }
 0x187   :  { %v1555_v39 = vpop.eup %1554  ;;  %v1310_v40 = vadd.f32 -1.0, %v1553_v38  ;;  %v464_v41 = vmul.f32 1.442695, %v435_v36 }
 0x188   :  { %v1312_v42 = vadd.f32 -1.0, %v1555_v39 }
 0x189   :  { %v491_v43 = vsel %vm416_vm14, %v383_v1, %v1310_v40  ;;  %1560 = vpow2.f32 %v464_v41  ;;  %v516_v1 = vld [vmem:[#allocation2 + $0x20] ss:$2 sm:$0xff] }
 0x18a   :  { %506 = vst.msk [vmem:[#allocation2 + $0x50] sm:$0xff] %vm180_vm0, %v491_v43  ;;  %v493_v49 = vsel %vm418_vm15, %v393_v2, %v1312_v42 }
 0x18b   :  { %508 = vst.msk [vmem:[#allocation2 + $0x60] sm:$0xff] %vm180_vm0, %v493_v49 }
 0x18d   :  { %v536_v44 = vld [vmem:[#allocation2 + $0x41] ss:$2 sm:$0xff]  ;;  %v520_v9 = vld [vmem:[#allocation2 + $0x40] ss:$2 sm:$0xff] }
 0x18e   :  { %v1557_v45 = vpop.eup %1556  ;;  %559 = vrot.lane.b32.xlu0 %v536_v44, %s1618_s16 }
 0x18f   :  { %v1559_v46 = vpop.eup %1558  ;;  %v1311_v47 = vadd.f32 -1.0, %v1557_v45 }
 0x190   :  { %v1313_v48 = vadd.f32 -1.0, %v1559_v46  ;;  %v839_v46 = vld [vmem:[%s2090_s1 + $0x38] sm:$0xff] }
 0x191   :  { %v492_v50 = vsel %vm417_vm4, %v388_v20, %v1311_v47  ;;  %v1971_v20 = vld [vmem:[%s2090_s1 + $0x30] ss:$0 sm:$0xff]  ;;  %v840_v47 = vld [vmem:[%s2090_s1 + $0x40] sm:$0xff] }
 0x192   :  { %507 = vst.msk [vmem:[#allocation2 + $0x58] sm:$0xff] %vm180_vm0, %v492_v50  ;;  %v494_v51 = vsel %vm419_vm5, %v398_v21, %v1313_v48  ;;  %v1508_v50 = vpack.c.bf16 %v840_v47, %v839_v46  ;;  %v1332_v46 = vld [vmem:[%s2090_s1 + $0x50] ss:$0 sm:$0xff] }
 0x193   :  { %v1561_v52 = vpop.eup %1560  ;;  %509 = vst.msk [vmem:[#allocation2 + $0x68] sm:$0xff] %vm180_vm0, %v494_v51 }
 0x194   :  { %v1314_v53 = vadd.f32 -1.0, %v1561_v52  ;;  %1509 = vmatprep.subr.bf16.mxu1 %v1508_v50 }
 0x196   :  { %v495_v54 = vsel %vm420_vm6, %v403_v33, %v1314_v53  ;;  %v841_v53 = vld [vmem:[%s2090_s1 + $0x48] sm:$0xff] }
 0x197   :  { %510 = vst.msk [vmem:[#allocation2 + $0x70] sm:$0xff] %vm180_vm0, %v495_v54 }
 0x199   :  { %v538_v55 = vld [vmem:[#allocation2 + $0x51] ss:$2 sm:$0xff]  ;;  %v522_v12 = vld [vmem:[#allocation2 + $0x50] ss:$2 sm:$0xff] }
 0x19a   :  { %v540_v56 = vld [vmem:[#allocation2 + $0x61] ss:$2 sm:$0xff]  ;;  %561 = vrot.lane.b32.xlu1 %v538_v55, %s1618_s16  ;;  %v524_v13 = vld [vmem:[#allocation2 + $0x60] ss:$2 sm:$0xff] }
 0x19b   :  { %563 = vrot.lane.b32.xlu0 %v540_v56, %s1618_s16 }
 0x19e   :  { %v542_v57 = vld [vmem:[#allocation2 + $0x71] ss:$2 sm:$0xff]  ;;  %v526_v17 = vld [vmem:[#allocation2 + $0x70] ss:$2 sm:$0xff] }
 0x19f   :  { %565 = vrot.lane.b32.xlu1 %v542_v57, %s1618_s16 }
 0x1e0   :  { %v552_v58 = vpop.permute.xlu0 %551 }
 0x1e1   :  { %v575_v60 = vsel %vm180_vm0, %v512_v59, %v552_v58 }
 0x1e2   :  { %1454 = vmatprep.mubr.msk.f32.mxu1 %vm196_vm2, %v575_v60 }
 0x1e8   :  { %v554_v61 = vpop.permute.xlu1 %553 }
 0x1e9   :  { %v576_v63 = vsel %vm180_vm0, %v514_v62, %v554_v61 }
 0x1ea   :  { %1455 = vmatmul.mubr.msk.f32.vlgmr.msra.gmra.mrb[6].mxu1 %vm196_vm2, %v576_v63 }
 0x1eb   :  { %1511 = vmatpush3.bf16.msra.mxu1 %v1508_v50 }
 0x1ec   :  { %1470 = vmatprep.subr.mxu1 %v841_v53 }
 0x1ef   :  { %1471 = vmatpush3.msra.mxu1 %v841_v53 }
 0x1f0   :  { %v556_v0 = vpop.permute.xlu0 %555 }
 0x1f1   :  { %v577_v2 = vsel %vm180_vm0, %v516_v1, %v556_v0 }
 0x1f2   :  { %1457 = vmatprep.mubr.msk.f32.mxu1 %vm196_vm2, %v577_v2 }
 0x1f8   :  { %v558_v3 = vpop.permute.xlu1 %557 }
 0x1f9   :  { %v578_v7 = vsel %vm180_vm0, %v518_v6, %v558_v3 }
 0x1fa   :  { %1458 = vmatmul.mubr.msk.f32.gmra.mrb[8].mxu1 %vm196_vm2, %v578_v7 }
 0x200   :  { %v560_v8 = vpop.permute.xlu0 %559 }
 0x201   :  { %v579_v10 = vsel %vm180_vm0, %v520_v9, %v560_v8 }
 0x202   :  { %1460 = vmatprep.mubr.msk.f32.mxu1 %vm196_vm2, %v579_v10 }
 0x20c   :  { %v562_v11 = vpop.permute.xlu1 %561 }
 0x20d   :  { %v564_v14 = vpop.permute.xlu0 %563  ;;  %v580_v15 = vsel %vm180_vm0, %v522_v12, %v562_v11 }
 0x20e   :  { %v581_v16 = vsel %vm180_vm0, %v524_v13, %v564_v14  ;;  %1461 = vmatmul.mubr.msk.f32.gmra.mrb[10].mxu1 %vm196_vm2, %v580_v15 }
 0x20f   :  { %1463 = vmatprep.mubr.msk.f32.mxu1 %vm196_vm2, %v581_v16 }
 0x211   :  { %v566_v18 = vpop.permute.xlu1 %565 }
 0x212   :  { %v582_v19 = vsel %vm180_vm0, %v526_v17, %v566_v18 }
 0x213   :  { %1464 = vmatmul.mubr.msk.f32.gmra.mrb[12].mxu1 %vm196_vm2, %v582_v19 }
 0x2bd   :  { %v1456_v21 = vpop.f32.mrb[6].mxu1 }
 0x2be   :  { %v686_v22 = vadd.f32 %v1456_v21, %v1971_v20  ;;  %v680_v23 = vpop.f32.mrb[7].mxu1 }
 0x2bf   :  { %v681_v24 = vadd.f32 %v1971_v20, %v680_v23 }
 0x2c0   :  { %v728_v25 = vmin.f32 %v686_v22, 0.0  ;;  %vm720_vm7 = vcmp.gt.f32.partialorder %v686_v22, 0.0 }
 0x2c1   :  { %v727_v26 = vmin.f32 %v681_v24, 0.0  ;;  %vm719_vm8 = vcmp.gt.f32.partialorder %v681_v24, 0.0 }
 0x2c2   :  { %v737_v27 = vmul.f32 1.442695, %v728_v25 }
 0x2c3   :  { %v735_v28 = vmul.f32 1.442695, %v727_v26 }
 0x2c4   :  { %1562 = vpow2.f32 %v737_v27 }
 0x2c5   :  { %1564 = vpow2.f32 %v735_v28 }
 0x2cd   :  { %v1459_v29 = vpop.f32.mrb[8].mxu1 }
 0x2ce   :  { %v1563_v30 = vpop.eup %1562  ;;  %v696_v31 = vadd.f32 %v1459_v29, %v1971_v20  ;;  %v690_v32 = vpop.f32.mrb[9].mxu1 }
 0x2cf   :  { %v1565_v33 = vpop.eup %1564  ;;  %v1325_v34 = vadd.f32 -1.0, %v1563_v30  ;;  %v691_v35 = vadd.f32 %v1971_v20, %v690_v32 }
 0x2d0   :  { %v1324_v36 = vadd.f32 -1.0, %v1565_v33  ;;  %v730_v37 = vmin.f32 %v696_v31, 0.0  ;;  %vm722_vm9 = vcmp.gt.f32.partialorder %v696_v31, 0.0 }
 0x2d1   :  { %v760_v38 = vsel %vm720_vm7, %v686_v22, %v1325_v34  ;;  %v729_v39 = vmin.f32 %v691_v35, 0.0  ;;  %vm721_vm10 = vcmp.gt.f32.partialorder %v691_v35, 0.0 }
 0x2d2   :  { %768 = vst.msk [vmem:[#allocation3 + $0x8] sm:$0xff] %vm180_vm0, %v760_v38  ;;  %v759_v40 = vsel %vm719_vm8, %v681_v24, %v1324_v36  ;;  %v741_v41 = vmul.f32 1.442695, %v730_v37  ;;  %vm1195_vm8 = vcmask 261120  }
 0x2d3   :  { %767 = vst.msk [vmem:[#allocation3] sm:$0xff] %vm180_vm0, %v759_v40  ;;  %v739_v42 = vmul.f32 1.442695, %v729_v39 }
 0x2d4   :  { %1566 = vpow2.f32 %v741_v41 }
 0x2d5   :  { %1568 = vpow2.f32 %v739_v42 }
 0x2da   :  { %v784_v43 = vld [vmem:[#allocation3 + $0x1] ss:$2 sm:$0xff]  ;;  %v776_v28 = vld [vmem:[#allocation3] ss:$2 sm:$0xff] }
 0x2db   :  { %803 = vrot.lane.b32.xlu0 %v784_v43, %s1618_s16 }
 0x2de   :  { %v1567_v49 = vpop.eup %1566 }
 0x2df   :  { %v1569_v44 = vpop.eup %1568  ;;  %v1327_v45 = vadd.f32 -1.0, %v1567_v49 }
 0x2e0   :  { %v1326_v48 = vadd.f32 -1.0, %v1569_v44 }
 0x2e1   :  { %v762_v51 = vsel %vm722_vm9, %v696_v31, %v1327_v45  ;;  %v1462_v52 = vpop.f32.mrb[10].mxu1 }
 0x2e2   :  { %770 = vst.msk [vmem:[#allocation3 + $0x18] sm:$0xff] %vm180_vm0, %v762_v51  ;;  %v761_v54 = vsel %vm721_vm10, %v691_v35, %v1326_v48  ;;  %v706_v55 = vadd.f32 %v1462_v52, %v1971_v20  ;;  %v700_v56 = vpop.f32.mrb[11].mxu1 }
 0x2e3   :  { %769 = vst.msk [vmem:[#allocation3 + $0x10] sm:$0xff] %vm180_vm0, %v761_v54  ;;  %v701_v57 = vadd.f32 %v1971_v20, %v700_v56 }
 0x2e4   :  { %v732_v58 = vmin.f32 %v706_v55, 0.0  ;;  %vm724_vm11 = vcmp.gt.f32.partialorder %v706_v55, 0.0 }
 0x2e5   :  { %v731_v59 = vmin.f32 %v701_v57, 0.0  ;;  %vm723_vm12 = vcmp.gt.f32.partialorder %v701_v57, 0.0 }
 0x2e6   :  { %v745_v60 = vmul.f32 1.442695, %v732_v58  ;;  %v1465_v61 = vpop.f32.mrb[12].mxu1 }
 0x2e7   :  { %v743_v62 = vmul.f32 1.442695, %v731_v59  ;;  %v716_v63 = vadd.f32 %v1465_v61, %v1971_v20  ;;  %v710_v0 = vpop.f32.mrb[13].mxu1 }
 0x2e8   :  { %1570 = vpow2.f32 %v745_v60  ;;  %v711_v1 = vadd.f32 %v1971_v20, %v710_v0 }
 0x2e9   :  { %1572 = vpow2.f32 %v743_v62  ;;  %v734_v2 = vmin.f32 %v716_v63, 0.0  ;;  %vm726_vm13 = vcmp.gt.f32.partialorder %v716_v63, 0.0 }
 0x2ea   :  { %v733_v3 = vmin.f32 %v711_v1, 0.0  ;;  %v792_v6 = vld [vmem:[#allocation3 + $0x2] ss:$2 sm:$0xff]  ;;  %v786_v7 = vld [vmem:[#allocation3 + $0x11] ss:$2 sm:$0xff]  ;;  %vm725_vm14 = vcmp.gt.f32.partialorder %v711_v1, 0.0 }
 0x2eb   :  { %v749_v8 = vmul.f32 1.442695, %v734_v2  ;;  %819 = vrot.lane.b32.xlu0 %v792_v6, %s1622_s21  ;;  %805 = vrot.lane.b32.xlu1 %v786_v7, %s1618_s16  ;;  %v778_v33 = vld [vmem:[#allocation3 + $0x10] ss:$2 sm:$0xff] }
 0x2ec   :  { %v747_v9 = vmul.f32 1.442695, %v733_v3 }
 0x2ed   :  { %1574 = vpow2.f32 %v749_v8  ;;  %v1025_v8 = vld [vmem:[%s2090_s1 + $0x58] sm:$0xff] }
 0x2ee   :  { %1576 = vpow2.f32 %v747_v9  ;;  %v1026_v9 = vld [vmem:[%s2090_s1 + $0x60] sm:$0xff] }
 0x2f2   :  { %v1571_v10 = vpop.eup %1570 }
 0x2f3   :  { %v1573_v11 = vpop.eup %1572  ;;  %v1329_v12 = vadd.f32 -1.0, %v1571_v10 }
 0x2f4   :  { %v1328_v13 = vadd.f32 -1.0, %v1573_v11  ;;  %v1512_v11 = vpack.c.bf16 %v1026_v9, %v1025_v8 }
 0x2f5   :  { %v764_v14 = vsel %vm724_vm11, %v706_v55, %v1329_v12 }
 0x2f6   :  { %772 = vst.msk [vmem:[#allocation3 + $0x28] sm:$0xff] %vm180_vm0, %v764_v14  ;;  %v763_v15 = vsel %vm723_vm12, %v701_v57, %v1328_v13  ;;  %1513 = vmatprep.subr.bf16.mxu1 %v1512_v11 }
 0x2f7   :  { %v1575_v16 = vpop.eup %1574  ;;  %771 = vst.msk [vmem:[#allocation3 + $0x20] sm:$0xff] %vm180_vm0, %v763_v15 }
 0x2f8   :  { %v1577_v17 = vpop.eup %1576  ;;  %v1331_v18 = vadd.f32 -1.0, %v1575_v16 }
 0x2f9   :  { %v1330_v19 = vadd.f32 -1.0, %v1577_v17 }
 0x2fa   :  { %v766_v20 = vsel %vm726_vm13, %v716_v63, %v1331_v18  ;;  %v1027_v18 = vld [vmem:[%s2090_s1 + $0x68] sm:$0xff] }
 0x2fb   :  { %774 = vst.msk [vmem:[#allocation3 + $0x38] sm:$0xff] %vm180_vm0, %v766_v20  ;;  %v765_v21 = vsel %vm725_vm14, %v711_v1, %v1330_v19 }
 0x2fc   :  { %773 = vst.msk [vmem:[#allocation3 + $0x30] sm:$0xff] %vm180_vm0, %v765_v21 }
 0x2fe   :  { %v794_v22 = vld [vmem:[#allocation3 + $0x12] ss:$2 sm:$0xff]  ;;  %v788_v23 = vld [vmem:[#allocation3 + $0x21] ss:$2 sm:$0xff] }
 0x2ff   :  { %821 = vrot.lane.b32.xlu1 %v794_v22, %s1622_s21  ;;  %807 = vrot.lane.b32.xlu0 %v788_v23, %s1618_s16  ;;  %v780_v38 = vld [vmem:[#allocation3 + $0x20] ss:$2 sm:$0xff] }
 0x303   :  { %v790_v24 = vld [vmem:[#allocation3 + $0x31] ss:$2 sm:$0xff]  ;;  %v796_v25 = vld [vmem:[#allocation3 + $0x22] ss:$2 sm:$0xff]  ;;  %v798_v26 = vld [vmem:[#allocation3 + $0x32] ss:$2 sm:$0xff] }
 0x304   :  { %809 = vrot.lane.b32.xlu1 %v790_v24, %s1618_s16  ;;  %823 = vrot.lane.b32.xlu0 %v796_v25, %s1622_s21  ;;  %v782_v43 = vld [vmem:[#allocation3 + $0x30] ss:$2 sm:$0xff] }
 0x308   :  { %825 = vrot.lane.b32.xlu1 %v798_v26, %s1622_s21 }
 0x34d   :  { %v804_v27 = vpop.permute.xlu0 %803 }
 0x34e   :  { %v831_v29 = vsel %vm180_vm0, %v776_v28, %v804_v27 }
 0x35d   :  { %v820_v30 = vpop.permute.xlu0 %819  ;;  %v806_v32 = vpop.permute.xlu1 %805 }
 0x35e   :  { %v835_v31 = vsel %vm196_vm2, %v831_v29, %v820_v30  ;;  %v832_v34 = vsel %vm180_vm0, %v778_v33, %v806_v32 }
 0x35f   :  { %1472 = vmatprep.mubr.msk.f32.mxu1 %vm220_vm3, %v835_v31 }
 0x371   :  { %v822_v35 = vpop.permute.xlu1 %821  ;;  %v808_v36 = vpop.permute.xlu0 %807 }
 0x372   :  { %v836_v37 = vsel %vm196_vm2, %v832_v34, %v822_v35  ;;  %v833_v39 = vsel %vm180_vm0, %v780_v38, %v808_v36 }
 0x373   :  { %1473 = vmatmul.mubr.msk.f32.vlgmr.msra.gmra.mrb[14].mxu1 %vm220_vm3, %v836_v37 }
 0x374   :  { %1515 = vmatpush3.bf16.msra.mxu1 %v1512_v11 }
 0x375   :  { %1482 = vmatprep.subr.mxu1 %v1027_v18 }
 0x376   :  { %v810_v40 = vpop.permute.xlu1 %809  ;;  %v824_v41 = vpop.permute.xlu0 %823 }
 0x377   :  { %v837_v42 = vsel %vm196_vm2, %v833_v39, %v824_v41  ;;  %v834_v49 = vsel %vm180_vm0, %v782_v43, %v810_v40 }
 0x378   :  { %1475 = vmatprep.mubr.msk.f32.mxu1 %vm220_vm3, %v837_v42  ;;  %1483 = vmatpush3.msra.mxu1 %v1027_v18  ;;  %v1350_v18 = vld [vmem:[%s2091_s2 + $0x20] ss:$0 sm:$0xff] }
 0x379   :  { %1516 = vmatprep.subr.bf16.mxu1 %v1619_v4 }
 0x37a   :  { %v826_v44 = vpop.permute.xlu1 %825 }
 0x37b   :  { %v838_v45 = vsel %vm196_vm2, %v834_v49, %v826_v44 }
 0x37c   :  { %1476 = vmatmul.mubr.msk.f32.gmra.mrb[16].mxu1 %vm220_vm3, %v838_v45  ;;  %v1154_v45 = vld [vmem:[%s2091_s2] sm:$0xff] }
 0x446   :  { %v1474_v47 = vpop.f32.mrb[14].mxu1 }
 0x447   :  { %v931_v48 = vadd.f32 %v1474_v47, %v1332_v46  ;;  %v925_v50 = vpop.f32.mrb[15].mxu1  ;;  %v1156_v47 = vld [vmem:[%s2091_s2 + $0x10] sm:$0xff] }
 0x448   :  { %v926_v51 = vadd.f32 %v1332_v46, %v925_v50  ;;  %v1157_v50 = vld [vmem:[%s2091_s2 + $0x18] sm:$0xff] }
 0x449   :  { %v949_v52 = vmin.f32 %v931_v48, 0.0  ;;  %vm945_vm15 = vcmp.gt.f32.partialorder %v931_v48, 0.0 }
 0x44a   :  { %v948_v53 = vmin.f32 %v926_v51, 0.0  ;;  %vm944_vm4 = vcmp.gt.f32.partialorder %v926_v51, 0.0 }
 0x44b   :  { %v954_v54 = vmul.f32 1.442695, %v949_v52 }
 0x44c   :  { %v952_v55 = vmul.f32 1.442695, %v948_v53 }
 0x44d   :  { %1578 = vpow2.f32 %v954_v54 }
 0x44e   :  { %1580 = vpow2.f32 %v952_v55 }
 0x44f   :  { %v1477_v56 = vpop.f32.mrb[16].mxu1 }
 0x450   :  { %v941_v57 = vadd.f32 %v1477_v56, %v1332_v46  ;;  %v935_v58 = vpop.f32.mrb[17].mxu1 }
 0x451   :  { %v936_v59 = vadd.f32 %v1332_v46, %v935_v58  ;;  %v1155_v46 = vld [vmem:[%s2091_s2 + $0x8] sm:$0xff] }
 0x452   :  { %v951_v60 = vmin.f32 %v941_v57, 0.0  ;;  %vm947_vm5 = vcmp.gt.f32.partialorder %v941_v57, 0.0 }
 0x453   :  { %v950_v61 = vmin.f32 %v936_v59, 0.0  ;;  %vm946_vm6 = vcmp.gt.f32.partialorder %v936_v59, 0.0 }
 0x454   :  { %v958_v62 = vmul.f32 1.442695, %v951_v60 }
 0x455   :  { %v956_v63 = vmul.f32 1.442695, %v950_v61 }
 0x456   :  { %1582 = vpow2.f32 %v958_v62 }
 0x457   :  { %v1579_v0 = vpop.eup %1578  ;;  %1584 = vpow2.f32 %v956_v63 }
 0x458   :  { %v1581_v1 = vpop.eup %1580  ;;  %v1338_v2 = vadd.f32 -1.0, %v1579_v0 }
 0x459   :  { %v1337_v3 = vadd.f32 -1.0, %v1581_v1 }
 0x45a   :  { %v965_v6 = vsel %vm945_vm15, %v931_v48, %v1338_v2  ;;  %v1517_v48 = vpack.c.bf16 %v1155_v46, %v1154_v45 }
 0x45b   :  { %969 = vst.msk [vmem:[#allocation4 + $0x8] sm:$0xff] %vm180_vm0, %v965_v6  ;;  %v964_v7 = vsel %vm944_vm4, %v926_v51, %v1337_v3  ;;  %v1520_v51 = vpack.c.bf16 %v1157_v50, %v1156_v47 }
 0x45c   :  { %968 = vst.msk [vmem:[#allocation4] sm:$0xff] %vm180_vm0, %v964_v7 }
 0x460   :  { %v1583_v10 = vpop.eup %1582 }
 0x461   :  { %v1585_v12 = vpop.eup %1584  ;;  %v1340_v13 = vadd.f32 -1.0, %v1583_v10 }
 0x462   :  { %v1339_v14 = vadd.f32 -1.0, %v1585_v12  ;;  %v974_v34 = vld [vmem:[#allocation4 + $0x8] sm:$0xff] }
 0x463   :  { %v967_v15 = vsel %vm947_vm5, %v941_v57, %v1340_v13  ;;  %v977_v16 = vld [vmem:[#allocation4 + $0x1] sm:$0xff] }
 0x464   :  { %971 = vst.msk [vmem:[#allocation4 + $0x18] sm:$0xff] %vm180_vm0, %v967_v15  ;;  %v966_v17 = vsel %vm946_vm6, %v936_v59, %v1339_v14  ;;  %989 = vrot.lane.b32.xlu0 %v977_v16, %s1618_s16  ;;  %v981_v19 = vld [vmem:[#allocation4 + $0x2] sm:$0xff] }
 0x465   :  { %970 = vst.msk [vmem:[#allocation4 + $0x10] sm:$0xff] %vm180_vm0, %v966_v17  ;;  %v973_v27 = vld [vmem:[#allocation4] sm:$0xff] }
 0x468   :  { %1005 = vrot.lane.b32.xlu0 %v981_v19, %s1622_s21 }
 0x46b   :  { %v980_v20 = vld [vmem:[#allocation4 + $0x19] sm:$0xff] }
 0x46c   :  { %995 = vrot.lane.b32.xlu1 %v980_v20, %s1618_s16  ;;  %v979_v21 = vld [vmem:[#allocation4 + $0x11] sm:$0xff]  ;;  %v978_v22 = vld [vmem:[#allocation4 + $0x9] sm:$0xff]  ;;  %v984_v25 = vld [vmem:[#allocation4 + $0x1a] sm:$0xff] }
 0x46d   :  { %993 = vrot.lane.b32.xlu0 %v979_v21, %s1618_s16  ;;  %v983_v23 = vld [vmem:[#allocation4 + $0x12] sm:$0xff]  ;;  %v982_v24 = vld [vmem:[#allocation4 + $0xa] sm:$0xff] }
 0x46e   :  { %v975_v36 = vld [vmem:[#allocation4 + $0x10] sm:$0xff]  ;;  %v976_v42 = vld [vmem:[#allocation4 + $0x18] sm:$0xff] }
 0x470   :  { %991 = vrot.lane.b32.xlu1 %v978_v22, %s1618_s16 }
 0x471   :  { %1009 = vrot.lane.b32.xlu0 %v983_v23, %s1622_s21 }
 0x474   :  { %1007 = vrot.lane.b32.xlu1 %v982_v24, %s1622_s21 }
 0x478   :  { %1011 = vrot.lane.b32.xlu1 %v984_v25, %s1622_s21 }
 0x4d6   :  { %v990_v26 = vpop.permute.xlu0 %989 }
 0x4d7   :  { %v1017_v28 = vsel %vm180_vm0, %v973_v27, %v990_v26 }
 0x4da   :  { %v1006_v29 = vpop.permute.xlu0 %1005 }
 0x4db   :  { %v1021_v30 = vsel %vm196_vm2, %v1017_v28, %v1006_v29 }
 0x4dc   :  { %1484 = vmatprep.mubr.msk.f32.mxu1 %vm220_vm3, %v1021_v30 }
 0x4de   :  { %v996_v31 = vpop.permute.xlu1 %995 }
 0x4df   :  { %v994_v32 = vpop.permute.xlu0 %993  ;;  %v1020_v43 = vsel %vm180_vm0, %v976_v42, %v996_v31 }
 0x4e0   :  { %v1019_v39 = vsel %vm180_vm0, %v975_v36, %v994_v32 }
 0x4e2   :  { %v992_v33 = vpop.permute.xlu1 %991 }
 0x4e3   :  { %v1010_v35 = vpop.permute.xlu0 %1009  ;;  %v1018_v37 = vsel %vm180_vm0, %v974_v34, %v992_v33 }
 0x4e4   :  { %v1023_v41 = vsel %vm196_vm2, %v1019_v39, %v1010_v35 }
 0x4e6   :  { %v1008_v38 = vpop.permute.xlu1 %1007 }
 0x4e7   :  { %v1022_v40 = vsel %vm196_vm2, %v1018_v37, %v1008_v38 }
 0x4e8   :  { %1485 = vmatmul.mubr.msk.f32.vlgmr.msra.gmra.mrb[18].mxu1 %vm220_vm3, %v1022_v40 }
 0x4e9   :  { %1487 = vmatprep.mubr.msk.f32.mxu1 %vm220_vm3, %v1023_v41  ;;  %1518 = vmatpush3.bf16.msra.mxu1 %v1517_v48 }
 0x4ea   :  { %v1012_v49 = vpop.permute.xlu1 %1011  ;;  %1519 = vmatprep.subr.bf16.mxu1 %v1619_v4 }
 0x4eb   :  { %v1024_v44 = vsel %vm196_vm2, %v1020_v43, %v1012_v49 }
 0x4ec   :  { %1488 = vmatmul.mubr.msk.f32.gmra.mrb[20].mxu1 %vm220_vm3, %v1024_v44 }
 0x4ed   :  { %1498 = vmatprep.mubr.msk.f32.mxu1 %vm1621_vm1, %v1620_v5  ;;  %1521 = vmatpush3.bf16.msra.mxu1 %v1520_v51  ;;  %v1341_v5 = vld [vmem:[%s2090_s1 + $0x70] ss:$0 sm:$0xff] }
 0x5bb   :  { %v1486_v52 = vpop.f32.mrb[18].mxu1 }
 0x5bc   :  { %v1117_v53 = vadd.f32 %v1486_v52, %v1341_v5  ;;  %v1111_v54 = vpop.f32.mrb[19].mxu1 }
 0x5bd   :  { %v1112_v55 = vadd.f32 %v1341_v5, %v1111_v54 }
 0x5be   :  { %v1135_v56 = vmin.f32 %v1117_v53, 0.0  ;;  %vm1131_vm2 = vcmp.gt.f32.partialorder %v1117_v53, 0.0 }
 0x5bf   :  { %v1134_v57 = vmin.f32 %v1112_v55, 0.0  ;;  %v1489_v58 = vpop.f32.mrb[20].mxu1  ;;  %vm1130_vm1 = vcmp.gt.f32.partialorder %v1112_v55, 0.0 }
 0x5c0   :  { %v1140_v59 = vmul.f32 1.442695, %v1135_v56  ;;  %v1127_v60 = vadd.f32 %v1489_v58, %v1341_v5  ;;  %v1121_v61 = vpop.f32.mrb[21].mxu1 }
 0x5c1   :  { %v1138_v62 = vmul.f32 1.442695, %v1134_v57  ;;  %v1122_v63 = vadd.f32 %v1341_v5, %v1121_v61 }
 0x5c2   :  { %1586 = vpow2.f32 %v1140_v59  ;;  %v1137_v4 = vmin.f32 %v1127_v60, 0.0  ;;  %vm1133_vm7 = vcmp.gt.f32.partialorder %v1127_v60, 0.0 }
 0x5c3   :  { %1588 = vpow2.f32 %v1138_v62  ;;  %v1136_v0 = vmin.f32 %v1122_v63, 0.0  ;;  %vm1132_vm3 = vcmp.gt.f32.partialorder %v1122_v63, 0.0 }
 0x5c4   :  { %v1144_v2 = vmul.f32 1.442695, %v1137_v4 }
 0x5c5   :  { %v1142_v1 = vmul.f32 1.442695, %v1136_v0 }
 0x5c7   :  { %1590 = vpow2.f32 %v1142_v1 }
 0x5c8   :  { %1592 = vpow2.f32 %v1144_v2 }
 0x5cc   :  { %v1587_v3 = vpop.eup %1586 }
 0x5cd   :  { %v1589_v6 = vpop.eup %1588  ;;  %v1347_v9 = vadd.f32 -1.0, %v1587_v3 }
 0x5ce   :  { %v1346_v7 = vadd.f32 -1.0, %v1589_v6 }
 0x5cf   :  { %v1151_v11 = vsel %vm1131_vm2, %v1117_v53, %v1347_v9 }
 0x5d0   :  { %v1150_v8 = vsel %vm1130_vm1, %v1112_v55, %v1346_v7 }
 0x5d1   :  { %v1591_v10 = vpop.eup %1590  ;;  %1163 = vxpose.xlu0.b32.start [1/4] (short) (narrow) %v1150_v8, 8 }
 0x5d2   :  { %v1348_v12 = vadd.f32 -1.0, %v1591_v10  ;;  %v1593_v13 = vpop.eup %1592 }
 0x5d3   :  { %v1349_v15 = vadd.f32 -1.0, %v1593_v13 }
 0x5d4   :  { %v1152_v14 = vsel %vm1132_vm3, %v1122_v63, %v1348_v12 }
 0x5d5   :  { %1164 = vxpose.xlu0.b32.cont [2/4] (short) (narrow) %v1151_v11, 8  ;;  %v1153_v16 = vsel %vm1133_vm7, %v1127_v60, %v1349_v15 }
 0x5d9   :  { %1165 = vxpose.xlu0.b32.cont [3/4] (short) (narrow) %v1152_v14, 8 }
 0x5dd   :  { %1166 = vxpose.xlu0.b32.end [4/4] (short) (narrow) %v1153_v16, 8 }
 0x651   :  { %v1179_v17 = vpop.trf.xlu0 }
 0x652   :  { %1499 = vmatmul.mubr.msk.f32.vlgmr.msra.gmra.mrb[22].mxu1 %vm1195_vm8, %v1179_v17 }
 0x725   :  { %v1265_v19 = vpop.f32.mrb[22].mxu1 }
 0x726   :  { %v1266_v20 = vadd.f32 %v1350_v18, %v1265_v19  ;;  %v1500_v21 = vpop.f32.mrb[23].mxu1 }
 0x728   :  { %1269 = vst.msk [vmem:[#allocation5] sm:$0xff] %vm180_vm0, %v1266_v20 }
 0x729   :  { %1605 = shalt.err (!%p1602_p4)
}
 0x72a   :  { %s1606_s18 = scalar_lea.hbm %s2092_s3, 128 }
 0x72b   :  { %p1607_p5 = scmp.ne.s32.totalorder %s2092_s3, %s1606_s18  ;;  %p1610_p6 = scmp.lt.u32.totalorder %s1606_s18, %s2092_s3 }
 0x72d   :  { %p1612_p7 = pnand %p1610_p6, %p1607_p5 }
 0x72f   :  { %1615 = shalt.err (!%p1612_p7)
}
 0x730   :  { %1279 = dma.vmem_to_hbm [thread:$0]  %s1277_s13, 128, %s2092_s3, [#allocation6]  }
 0x731   :  { %1616 = dma.done.wait [#allocation6], 128  }
 0x732   :  { %1617 = vsyncadd [#allocation6], 4294967168 }
 0x733   :  { %1283 = vsyncpa [#allocation6], 1 }

</bundles_post_ra>
